<compile_context>
chip_gen: v5e
topology: v5e:2x2
jax: 0.10.0
libtpu: 0.0.40
codegen_flags: <defaults>
</compile_context>

<pallas_src>
import math

import jax
import jax.numpy as jnp
from jax.experimental import pallas as pl
from jax.experimental.pallas import tpu as pltpu


def _round_up(x, m):
    return (x + m - 1) // m * m


def _qmeasure_kernel(xr_ref, xi_ref, wr_ref, wni_ref, o_ref, acc_ref):
    # acc += xr @ wr + xi @ (-wi)   (both matmuls on the MXU, f32 accumulation)
    @pl.when(pl.program_id(1) == 0)
    def _init():
        acc_ref[...] = jnp.zeros_like(acc_ref)

    acc_ref[...] += (
        jnp.dot(xr_ref[...], wr_ref[...], preferred_element_type=jnp.float32)
        + jnp.dot(xi_ref[...], wni_ref[...], preferred_element_type=jnp.float32)
    )

    @pl.when(pl.program_id(1) == pl.num_programs(1) - 1)
    def _finish():
        o_ref[...] = acc_ref[...].astype(o_ref.dtype)


def init_qmeasurement_kernel(embed_dim, dtype=jnp.float32):
    """Deterministic parameter init: stack([eye(E), zeros(E,E)], axis=-1) -> (E, E, 2)."""
    real = jnp.eye(embed_dim, dtype=dtype)
    imag = jnp.zeros((embed_dim, embed_dim), dtype=dtype)
    return jnp.stack([real, imag], axis=-1)


def qmeasurement_forward(inputs, kernel_param, *, bm_cap=512,
                         vmem_budget_bytes=32 << 20):
    """Pallas implementation of QMeasurement.forward."""
    if not isinstance(inputs, (list, tuple)) or len(inputs) != 2:
        raise ValueError("This layer should be called on a list of 2 inputs.")
    input_real, input_imag = inputs
    E = kernel_param.shape[0]
    K = E * E

    compute_dtype = input_real.dtype
    out_dtype = compute_dtype

    # ---- projector weights, built directly in (a, b, m) layout (no .T copy) ----
    # wr[a*E+b, m] = r[m,a]*r[m,b] + i[m,a]*i[m,b]   == flat(P_real).T
    # wi[a*E+b, m] = i[m,a]*r[m,b] - r[m,a]*i[m,b]   == flat(P_imag).T
    rk = kernel_param[:, :, 0].astype(jnp.float32)
    ik = kernel_param[:, :, 1].astype(jnp.float32)
    wr = (jnp.einsum("ma,mb->abm", rk, rk)
          + jnp.einsum("ma,mb->abm", ik, ik)).reshape(K, E)
    wi = (jnp.einsum("ma,mb->abm", ik, rk)
          - jnp.einsum("ma,mb->abm", rk, ik)).reshape(K, E)
    wr = wr.astype(compute_dtype)
    wni = (-wi).astype(compute_dtype)   # fold the minus: out = xr@wr + xi@(-wi)

    # ---- flatten batch dims (keep native dtype: mem-bound, no f32 up-cast) ----
    lead = input_real.shape[:-2]
    B = math.prod(lead) if lead else 1
    xr = input_real.reshape(B, K)
    xi = input_imag.reshape(B, K)

    # pad tiny batches to one sublane so block shapes remain legal
    B_eff = B
    if B < 8:
        pad = 8 - B
        xr = jnp.pad(xr, ((0, pad), (0, 0)))
        xi = jnp.pad(xi, ((0, pad), (0, 0)))
        B_eff = 8

    # ---- tile selection ----
    bm = B_eff if B_eff <= bm_cap else bm_cap          # bm_cap is a multiple of 8
    in_itemsize = jnp.dtype(compute_dtype).itemsize
    out_itemsize = jnp.dtype(out_dtype).itemsize
    E_lanes = _round_up(E, 128)                        # lane padding in VMEM

    def step_bytes(tk):
        return (2 * 2 * bm * tk * in_itemsize          # xr/xi, double-buffered
                + 2 * 2 * tk * E_lanes * in_itemsize   # wr/wni, double-buffered
                + 2 * bm * E_lanes * out_itemsize      # output, double-buffered
                + bm * E_lanes * 4)                    # f32 accumulator scratch

    if step_bytes(K) <= vmem_budget_bytes:
        tk = K                                         # single K step
    else:
        # largest multiple of 128 that exactly divides K and fits the budget
        tk = 0
        for d in range(128, K, 128):
            if K % d == 0 and step_bytes(d) <= vmem_budget_bytes:
                tk = d
        if tk == 0:
            tk = K  # no clean split; fall back to full-K blocks (raise VMEM limit)

    nb = pl.cdiv(B_eff, bm)
    nk = K // tk

    vmem_limit = int(min(64 << 20, max(16 << 20, step_bytes(tk) * 5 // 4 + (2 << 20))))

    cost = pl.CostEstimate(
        flops=4 * B_eff * K * E,                       # two (B,K)@(K,E) matmuls
        transcendentals=0,
        bytes_accessed=(2 * B_eff * K * in_itemsize
                        + 2 * K * E * in_itemsize
                        + B_eff * E * out_itemsize),
    )

    out = pl.pallas_call(
        _qmeasure_kernel,
        out_shape=jax.ShapeDtypeStruct((B_eff, E), out_dtype),
        grid=(nb, nk),
        in_specs=[
            pl.BlockSpec((bm, tk), lambda i, k: (i, k)),   # input_real flat
            pl.BlockSpec((bm, tk), lambda i, k: (i, k)),   # input_imag flat
            pl.BlockSpec((tk, E), lambda i, k: (k, 0)),    # flat(P_real).T
            pl.BlockSpec((tk, E), lambda i, k: (k, 0)),    # -flat(P_imag).T
        ],
        out_specs=pl.BlockSpec((bm, E), lambda i, k: (i, 0)),
        scratch_shapes=[pltpu.VMEM((bm, E), jnp.float32)],
        compiler_params=pltpu.CompilerParams(
            dimension_semantics=("parallel", "arbitrary"),
            vmem_limit_bytes=vmem_limit,
        ),
        cost_estimate=cost,
    )(xr, xi, wr, wni)

    if B_eff != B:
        out = out[:B]
    return out.reshape(*lead, E)


def _reference_forward(inputs, kernel_param):
    """Pure-JAX reference mirroring the PyTorch code, for verification."""
    input_real, input_imag = inputs
    E = kernel_param.shape[0]
    rk = kernel_param[:, :, 0][:, :, None]
    ik = kernel_param[:, :, 1][:, :, None]
    p_real = jnp.matmul(rk, jnp.swapaxes(rk, 1, 2)) + jnp.matmul(ik, jnp.swapaxes(ik, 1, 2))
    p_imag = jnp.matmul(ik, jnp.swapaxes(rk, 1, 2)) - jnp.matmul(rk, jnp.swapaxes(ik, 1, 2))
    xr = input_real.reshape(*input_real.shape[:-2], E * E)
    xi = input_imag.reshape(*input_imag.shape[:-2], E * E)
    return (jnp.matmul(xr, p_real.reshape(E, E * E).T)
            - jnp.matmul(xi, p_imag.reshape(E, E * E).T))


if __name__ == "__main__":
    embed_dim = 16
    batch, seq = 2, 8

    key = jax.random.PRNGKey(0)
    k_r, k_i = jax.random.split(key)
    # real / imaginary parts of density-matrix-like tensors, shape (B, S, E, E)
    input_real = jax.random.normal(k_r, (batch, seq, embed_dim, embed_dim), dtype=jnp.float32)
    input_imag = jax.random.normal(k_i, (batch, seq, embed_dim, embed_dim), dtype=jnp.float32)

    kernel_param = init_qmeasurement_kernel(embed_dim)

    out = qmeasurement_forward([input_real, input_imag], kernel_param)
    out = jax.block_until_ready(out)

    ref = _reference_forward([input_real, input_imag], kernel_param)
    assert out.shape == (batch, seq, embed_dim), out.shape
    assert jnp.allclose(out, ref, atol=1e-5, rtol=1e-5), "mismatch vs reference"

    print("KERNEL_OK")
</pallas_src>

<mosaic_0001>
module attributes {stable_mosaic.version = 11 : i64} {
  func.func @_qmeasure_kernel(%arg0: i32, %arg1: i32, %arg2: memref<16x256xf32, #tpu.memory_space<vmem>>, %arg3: memref<16x256xf32, #tpu.memory_space<vmem>>, %arg4: memref<256x16xf32, #tpu.memory_space<vmem>>, %arg5: memref<256x16xf32, #tpu.memory_space<vmem>>, %arg6: memref<16x16xf32, #tpu.memory_space<vmem>>, %arg7: memref<16x16xf32, #tpu.memory_space<vmem>>) attributes {dimension_semantics = [#tpu.dimension_semantics<parallel>, #tpu.dimension_semantics<arbitrary>], iteration_bounds = array<i64: 1, 1>, scalar_prefetch = 0 : i64, scratch_operands = 1 : i64, tpu.core_type = #tpu.core_type<tc>, window_params = [{transform_indices = @transform_0, window_bounds = array<i64: 16, 256>}, {transform_indices = @transform_1, window_bounds = array<i64: 16, 256>}, {transform_indices = @transform_2, window_bounds = array<i64: 256, 16>}, {transform_indices = @transform_3, window_bounds = array<i64: 256, 16>}, {transform_indices = @transform_4, window_bounds = array<i64: 16, 16>}]} {
    %c0_i32 = arith.constant 0 : i32
    %0 = arith.cmpi eq, %arg1, %c0_i32 : i32
    %1 = arith.extui %0 : i1 to i32
    %c0_i32_0 = arith.constant 0 : i32
    %2 = arith.cmpi ne, %1, %c0_i32_0 : i32
    scf.if %2 {
      %cst_15 = arith.constant 0.000000e+00 : f32
      %16 = vector.broadcast %cst_15 : f32 to vector<16x16xf32>
      %c0_16 = arith.constant 0 : index
      %c0_17 = arith.constant 0 : index
      %17 = vector.load %arg7[%c0_16, %c0_17] : memref<16x16xf32, #tpu.memory_space<vmem>>, vector<16x16xf32>
      tpu.vector_store %arg7[%c0_16, %c0_17], %16 {strides = array<i32>} : memref<16x16xf32, #tpu.memory_space<vmem>>, vector<16x16xf32>,
    } else {
    }
    %c0 = arith.constant 0 : index
    %c0_1 = arith.constant 0 : index
    %3 = vector.load %arg7[%c0, %c0_1] : memref<16x16xf32, #tpu.memory_space<vmem>>, vector<16x16xf32>
    %c0_2 = arith.constant 0 : index
    %c0_3 = arith.constant 0 : index
    %4 = vector.load %arg2[%c0_2, %c0_3] : memref<16x256xf32, #tpu.memory_space<vmem>>, vector<16x256xf32>
    %c0_4 = arith.constant 0 : index
    %c0_5 = arith.constant 0 : index
    %5 = vector.load %arg4[%c0_4, %c0_5] : memref<256x16xf32, #tpu.memory_space<vmem>>, vector<256x16xf32>
    %cst = arith.constant dense<0.000000e+00> : vector<16x16xf32>
    %6 = tpu.matmul %4, %5, %cst {dimension_numbers = #tpu.dot_dimension_numbers<[1], [0], [0], [1], [0, 0, 1, 1], [], []>} : vector<16x256xf32>, vector<256x16xf32>, vector<16x16xf32> -> vector<16x16xf32>
    %c0_6 = arith.constant 0 : index
    %c0_7 = arith.constant 0 : index
    %7 = vector.load %arg3[%c0_6, %c0_7] : memref<16x256xf32, #tpu.memory_space<vmem>>, vector<16x256xf32>
    %c0_8 = arith.constant 0 : index
    %c0_9 = arith.constant 0 : index
    %8 = vector.load %arg5[%c0_8, %c0_9] : memref<256x16xf32, #tpu.memory_space<vmem>>, vector<256x16xf32>
    %cst_10 = arith.constant dense<0.000000e+00> : vector<16x16xf32>
    %9 = tpu.matmul %7, %8, %cst_10 {dimension_numbers = #tpu.dot_dimension_numbers<[1], [0], [0], [1], [0, 0, 1, 1], [], []>} : vector<16x256xf32>, vector<256x16xf32>, vector<16x16xf32> -> vector<16x16xf32>
    %10 = arith.addf %6, %9 : vector<16x16xf32>
    %11 = arith.addf %3, %10 : vector<16x16xf32>
    %c0_11 = arith.constant 0 : index
    %c0_12 = arith.constant 0 : index
    %12 = vector.load %arg7[%c0_11, %c0_12] : memref<16x16xf32, #tpu.memory_space<vmem>>, vector<16x16xf32>
    tpu.vector_store %arg7[%c0_11, %c0_12], %11 {strides = array<i32>} : memref<16x16xf32, #tpu.memory_space<vmem>>, vector<16x16xf32>,
    %c0_i32_13 = arith.constant 0 : i32
    %13 = arith.cmpi eq, %arg1, %c0_i32_13 : i32
    %14 = arith.extui %13 : i1 to i32
    %c0_i32_14 = arith.constant 0 : i32
    %15 = arith.cmpi ne, %14, %c0_i32_14 : i32
    scf.if %15 {
      %c0_15 = arith.constant 0 : index
      %c0_16 = arith.constant 0 : index
      %16 = vector.load %arg7[%c0_15, %c0_16] : memref<16x16xf32, #tpu.memory_space<vmem>>, vector<16x16xf32>
      %c0_17 = arith.constant 0 : index
      %c0_18 = arith.constant 0 : index
      %17 = vector.load %arg6[%c0_17, %c0_18] : memref<16x16xf32, #tpu.memory_space<vmem>>, vector<16x16xf32>
      tpu.vector_store %arg6[%c0_17, %c0_18], %16 {strides = array<i32>} : memref<16x16xf32, #tpu.memory_space<vmem>>, vector<16x16xf32>,
    } else {
    }
    return
  }
  func.func @transform_0(%arg0: i32, %arg1: i32) -> (i32, i32) {
    %c0_i32 = arith.constant 0 : i32
    return %arg0, %arg1 : i32, i32
  }
  func.func @transform_1(%arg0: i32, %arg1: i32) -> (i32, i32) {
    %c0_i32 = arith.constant 0 : i32
    return %arg0, %arg1 : i32, i32
  }
  func.func @transform_2(%arg0: i32, %arg1: i32) -> (i32, i32) {
    %c0_i32 = arith.constant 0 : i32
    %c0_i32_0 = arith.constant 0 : i32
    return %arg1, %c0_i32 : i32, i32
  }
  func.func @transform_3(%arg0: i32, %arg1: i32) -> (i32, i32) {
    %c0_i32 = arith.constant 0 : i32
    %c0_i32_0 = arith.constant 0 : i32
    return %arg1, %c0_i32 : i32, i32
  }
  func.func @transform_4(%arg0: i32, %arg1: i32) -> (i32, i32) {
    %c0_i32 = arith.constant 0 : i32
    %c0_i32_0 = arith.constant 0 : i32
    return %arg0, %c0_i32 : i32, i32
  }
}

</mosaic_0001>

<bundles_post_ra>
// kernel: tpu_custom_call.1
= control target key start
LH: loop header
LB: loop body
LE: loop exit
PB: predicated region body
PF: predicated region fallthrough
CT: control target
= control target key end

     0   :  { %s505_s0 = inlined_call_operand.vmem [shape: f32[16,256], index: 0, kind: input, shape index: {}]   ;;  %s506_s1 = inlined_call_operand.vmem [shape: f32[16,256], index: 1, kind: input, shape index: {}]   ;;  %s507_s2 = inlined_call_operand.vmem [shape: f32[256,16], index: 2, kind: input, shape index: {}]   ;;  %s508_s3 = inlined_call_operand.vmem [shape: f32[256,16], index: 3, kind: input, shape index: {}]   ;;  %s509_s4 = inlined_call_operand.hbm [shape: f32[16,16], index: 4, kind: output, shape index: {}]  }
   0x1   :  { %v46_v0 = vld [vmem:[%s507_s2 + $0x78] sm:$0xff]  ;;  %v45_v1 = vld [vmem:[%s507_s2 + $0x70] sm:$0xff]  ;;  %v44_v5 = vld [vmem:[%s507_s2 + $0x68] sm:$0xff] }
   0x2   :  { %v62_v2 = vld [vmem:[%s507_s2 + $0xf8] sm:$0xff]  ;;  %145 = vmatpush.msra.mxu2 %v46_v0  ;;  %v61_v6 = vld [vmem:[%s507_s2 + $0xf0] sm:$0xff]  ;;  %v60_v9 = vld [vmem:[%s507_s2 + $0xe8] sm:$0xff] }
   0x3   :  { %168 = vmatpush.msra.mxu3 %v62_v2  ;;  %v82_v3 = vld [vmem:[%s508_s3 + $0x78] sm:$0xff]  ;;  %v81_v7 = vld [vmem:[%s508_s3 + $0x70] sm:$0xff]  ;;  %v80_v10 = vld [vmem:[%s508_s3 + $0x68] sm:$0xff] }
   0x4   :  { %v98_v4 = vld [vmem:[%s508_s3 + $0xf8] sm:$0xff]  ;;  %99 = vmatpush.msra.mxu0 %v82_v3  ;;  %v97_v8 = vld [vmem:[%s508_s3 + $0xf0] sm:$0xff]  ;;  %146 = vmatpush.msra.mxu2 %v45_v1  ;;  %v43_v11 = vld [vmem:[%s507_s2 + $0x60] sm:$0xff] }
   0x5   :  { %122 = vmatpush.msra.mxu1 %v98_v4  ;;  %169 = vmatpush.msra.mxu3 %v61_v6  ;;  %v96_v12 = vld [vmem:[%s508_s3 + $0xe8] sm:$0xff]  ;;  %v59_v13 = vld [vmem:[%s507_s2 + $0xe0] sm:$0xff]  ;;  %v42_v16 = vld [vmem:[%s507_s2 + $0x58] sm:$0xff] }
   0x6   :  { %100 = vmatpush.msra.mxu0 %v81_v7  ;;  %147 = vmatpush.msra.mxu2 %v44_v5  ;;  %v79_v14 = vld [vmem:[%s508_s3 + $0x60] sm:$0xff]  ;;  %v58_v17 = vld [vmem:[%s507_s2 + $0xd8] sm:$0xff]  ;;  %v41_v20 = vld [vmem:[%s507_s2 + $0x50] sm:$0xff] }
   0x7   :  { %123 = vmatpush.msra.mxu1 %v97_v8  ;;  %170 = vmatpush.msra.mxu3 %v60_v9  ;;  %v95_v15 = vld [vmem:[%s508_s3 + $0xe0] sm:$0xff]  ;;  %v78_v18 = vld [vmem:[%s508_s3 + $0x58] sm:$0xff]  ;;  %v57_v21 = vld [vmem:[%s507_s2 + $0xd0] sm:$0xff] }
   0x8   :  { %101 = vmatpush.msra.mxu0 %v80_v10  ;;  %148 = vmatpush.msra.mxu2 %v43_v11  ;;  %v94_v19 = vld [vmem:[%s508_s3 + $0xd8] sm:$0xff]  ;;  %v77_v22 = vld [vmem:[%s508_s3 + $0x50] sm:$0xff]  ;;  %v40_v24 = vld [vmem:[%s507_s2 + $0x48] sm:$0xff] }
   0x9   :  { %124 = vmatpush.msra.mxu1 %v96_v12  ;;  %171 = vmatpush.msra.mxu3 %v59_v13  ;;  %v93_v23 = vld [vmem:[%s508_s3 + $0xd0] sm:$0xff]  ;;  %v56_v25 = vld [vmem:[%s507_s2 + $0xc8] sm:$0xff]  ;;  %v39_v28 = vld [vmem:[%s507_s2 + $0x40] sm:$0xff] }
   0xa   :  { %102 = vmatpush.msra.mxu0 %v79_v14  ;;  %149 = vmatpush.msra.mxu2 %v42_v16  ;;  %v76_v26 = vld [vmem:[%s508_s3 + $0x48] sm:$0xff]  ;;  %v55_v29 = vld [vmem:[%s507_s2 + $0xc0] sm:$0xff]  ;;  %v38_v32 = vld [vmem:[%s507_s2 + $0x38] sm:$0xff] }
   0xb   :  { %125 = vmatpush.msra.mxu1 %v95_v15  ;;  %172 = vmatpush.msra.mxu3 %v58_v17  ;;  %v92_v27 = vld [vmem:[%s508_s3 + $0xc8] sm:$0xff]  ;;  %v75_v30 = vld [vmem:[%s508_s3 + $0x40] sm:$0xff]  ;;  %v54_v33 = vld [vmem:[%s507_s2 + $0xb8] sm:$0xff] }
   0xc   :  { %103 = vmatpush.msra.mxu0 %v78_v18  ;;  %150 = vmatpush.msra.mxu2 %v41_v20  ;;  %v91_v31 = vld [vmem:[%s508_s3 + $0xc0] sm:$0xff]  ;;  %v74_v34 = vld [vmem:[%s508_s3 + $0x38] sm:$0xff]  ;;  %v37_v36 = vld [vmem:[%s507_s2 + $0x30] sm:$0xff] }
   0xd   :  { %126 = vmatpush.msra.mxu1 %v94_v19  ;;  %173 = vmatpush.msra.mxu3 %v57_v21  ;;  %v90_v35 = vld [vmem:[%s508_s3 + $0xb8] sm:$0xff]  ;;  %v53_v37 = vld [vmem:[%s507_s2 + $0xb0] sm:$0xff]  ;;  %v36_v40 = vld [vmem:[%s507_s2 + $0x28] sm:$0xff] }
   0xe   :  { %104 = vmatpush.msra.mxu0 %v77_v22  ;;  %151 = vmatpush.msra.mxu2 %v40_v24  ;;  %v73_v38 = vld [vmem:[%s508_s3 + $0x30] sm:$0xff]  ;;  %v52_v41 = vld [vmem:[%s507_s2 + $0xa8] sm:$0xff]  ;;  %v35_v44 = vld [vmem:[%s507_s2 + $0x20] sm:$0xff] }
   0xf   :  { %127 = vmatpush.msra.mxu1 %v93_v23  ;;  %174 = vmatpush.msra.mxu3 %v56_v25  ;;  %v89_v39 = vld [vmem:[%s508_s3 + $0xb0] sm:$0xff]  ;;  %v72_v42 = vld [vmem:[%s508_s3 + $0x28] sm:$0xff]  ;;  %v51_v45 = vld [vmem:[%s507_s2 + $0xa0] sm:$0xff] }
  0x10   :  { %105 = vmatpush.msra.mxu0 %v76_v26  ;;  %152 = vmatpush.msra.mxu2 %v39_v28  ;;  %v88_v43 = vld [vmem:[%s508_s3 + $0xa8] sm:$0xff]  ;;  %v71_v46 = vld [vmem:[%s508_s3 + $0x20] sm:$0xff]  ;;  %v34_v48 = vld [vmem:[%s507_s2 + $0x18] sm:$0xff] }
  0x11   :  { %128 = vmatpush.msra.mxu1 %v92_v27  ;;  %175 = vmatpush.msra.mxu3 %v55_v29  ;;  %v87_v47 = vld [vmem:[%s508_s3 + $0xa0] sm:$0xff]  ;;  %v50_v49 = vld [vmem:[%s507_s2 + $0x98] sm:$0xff]  ;;  %v33_v52 = vld [vmem:[%s507_s2 + $0x10] sm:$0xff] }
  0x12   :  { %106 = vmatpush.msra.mxu0 %v75_v30  ;;  %153 = vmatpush.msra.mxu2 %v38_v32  ;;  %v70_v50 = vld [vmem:[%s508_s3 + $0x18] sm:$0xff]  ;;  %v49_v53 = vld [vmem:[%s507_s2 + $0x90] sm:$0xff] }
  0x13   :  { %129 = vmatpush.msra.mxu1 %v91_v31  ;;  %176 = vmatpush.msra.mxu3 %v54_v33  ;;  %v86_v51 = vld [vmem:[%s508_s3 + $0x98] sm:$0xff] }
  0x14   :  { %107 = vmatpush.msra.mxu0 %v74_v34  ;;  %154 = vmatpush.msra.mxu2 %v37_v36 }
  0x15   :  { %130 = vmatpush.msra.mxu1 %v90_v35  ;;  %177 = vmatpush.msra.mxu3 %v53_v37 }
  0x16   :  { %108 = vmatpush.msra.mxu0 %v73_v38  ;;  %155 = vmatpush.msra.mxu2 %v36_v40 }
  0x17   :  { %131 = vmatpush.msra.mxu1 %v89_v39  ;;  %178 = vmatpush.msra.mxu3 %v52_v41 }
  0x18   :  { %109 = vmatpush.msra.mxu0 %v72_v42  ;;  %156 = vmatpush.msra.mxu2 %v35_v44 }
  0x19   :  { %132 = vmatpush.msra.mxu1 %v88_v43  ;;  %179 = vmatpush.msra.mxu3 %v51_v45 }
  0x1a   :  { %110 = vmatpush.msra.mxu0 %v71_v46 }
  0x1b   :  { %133 = vmatpush.msra.mxu1 %v87_v47 }
  0x1c   :  { %9 = vsyncpa [#allocation4], 0  ;;  %157 = vmatpush.msra.mxu2 %v34_v48  ;;  %180 = vmatpush.msra.mxu3 %v50_v49  ;;  %v69_v54 = vld [vmem:[%s508_s3 + $0x10] sm:$0xff]  ;;  %v32_v56 = vld [vmem:[%s507_s2 + $0x8] sm:$0xff]  ;;  %vm22_vm0 = vcmask 130048   ;;  %v251_v8 = vmov 0.0  }
  0x1d   :  { %v85_v55 = vld [vmem:[%s508_s3 + $0x90] sm:$0xff]  ;;  %111 = vmatpush.msra.mxu0 %v70_v50  ;;  %134 = vmatpush.msra.mxu1 %v86_v51  ;;  %v48_v57 = vld [vmem:[%s507_s2 + $0x88] sm:$0xff]  ;;  %v31_v60 = vld [vmem:[%s507_s2] sm:$0xff]  ;;  %23 = vst.msk [vmem:[#allocation2] sm:$0xff] %vm22_vm0, %v251_v8  ;;  %s209_s29 = sshll.u32 %s509_s4, 4  ;;  %s253_s30 = smov 128   ;;  %s210_s29 = int_to_ptr.hbm [resolvable:$true] %s209_s29 }
  0x1e   :  { %158 = vmatpush.msra.mxu2 %v33_v52  ;;  %181 = vmatpush.msra.mxu3 %v49_v53  ;;  %v68_v58 = vld [vmem:[%s508_s3 + $0x8] sm:$0xff]  ;;  %v47_v61 = vld [vmem:[%s507_s2 + $0x80] sm:$0xff]  ;;  %v29_v4 = vld [vmem:[%s505_s0 + $0x10] sm:$0xff]  ;;  %24 = vst.msk [vmem:[#allocation2 + $0x8] sm:$0xff] %vm22_vm0, %v251_v8  ;;  %s254_s5 = smov 8  }
  0x1f   :  { %v84_v59 = vld [vmem:[%s508_s3 + $0x88] sm:$0xff]  ;;  %112 = vmatpush.msra.mxu0 %v69_v54  ;;  %135 = vmatpush.msra.mxu1 %v85_v55  ;;  %v27_v62 = vld [vmem:[%s505_s0] sm:$0xff]  ;;  %v30_v5 = vld [vmem:[%s505_s0 + $0x18] sm:$0xff] }
  0x20   :  { %159 = vmatpush.msra.mxu2 %v32_v56  ;;  %182 = vmatpush.msra.mxu3 %v48_v57  ;;  %v28_v63 = vld [vmem:[%s505_s0 + $0x8] sm:$0xff]  ;;  %v67_v0 = vld [vmem:[%s508_s3] sm:$0xff]  ;;  %v65_v6 = vld [vmem:[%s506_s1 + $0x10] sm:$0xff]  ;;  %s252_s0 = smov [#allocation3]  }
  0x21   :  { %113 = vmatpush.msra.mxu0 %v68_v58  ;;  %136 = vmatpush.msra.mxu1 %v84_v59  ;;  %v83_v1 = vld [vmem:[%s508_s3 + $0x80] sm:$0xff]  ;;  %v64_v3 = vld [vmem:[%s506_s1 + $0x8] sm:$0xff]  ;;  %v66_v7 = vld [vmem:[%s506_s1 + $0x18] sm:$0xff] }
  0x22   :  { %160 = vmatpush.msra.mxu2 %v31_v60  ;;  %183 = vmatpush.msra.mxu3 %v47_v61  ;;  %v63_v2 = vld [vmem:[%s506_s1] sm:$0xff]  ;;  %s207_s1 = sshll.u32 %s252_s0, 4  ;;  %s208_s1 = int_to_ptr.vmem [resolvable:$true] %s207_s1 }
  0x23   :  { %161 = vmatmul.f32.vlgmr.msra.gmra.mxu2 %v27_v62  ;;  %184 = vmatmul.f32.vlgmr.msra.gmra.mxu3 %v28_v63 }
  0x24   :  { %114 = vmatpush.msra.mxu0 %v67_v0  ;;  %137 = vmatpush.msra.mxu1 %v83_v1  ;;  %v25_v15 = vld [vmem:[#allocation2] sm:$0xff] }
  0x25   :  { %115 = vmatmul.f32.vlgmr.msra.gmra.mxu0 %v63_v2  ;;  %138 = vmatmul.f32.vlgmr.msra.gmra.mxu1 %v64_v3  ;;  %v26_v24 = vld [vmem:[#allocation2 + $0x8] sm:$0xff] }
  0x2b   :  { %164 = vmatmul.f32.gmra.mxu2 %v29_v4  ;;  %187 = vmatmul.f32.gmra.mxu3 %v30_v5 }
  0x2d   :  { %118 = vmatmul.f32.gmra.mxu0 %v65_v6  ;;  %141 = vmatmul.f32.gmra.mxu1 %v66_v7 }
  0xa2   :  { %v116_v9 = vpop.f32.mrf.mxu0  ;;  %v139_v10 = vpop.f32.mrf.mxu1 }
  0xa3   :  { %v140_v11 = vadd.f32 %v139_v10, %v116_v9 }
  0xa6   :  { %v162_v12 = vpop.f32.mrf.mxu2  ;;  %v185_v13 = vpop.f32.mrf.mxu3 }
  0xa7   :  { %v163_v14 = vadd.f32 %v162_v12, %v140_v11 }
  0xa9   :  { %v186_v16 = vadd.f32 %v185_v13, %v163_v14 }
  0xaa   :  { %v119_v17 = vpop.f32.mrf.mxu0  ;;  %v142_v18 = vpop.f32.mrf.mxu1 }
  0xab   :  { %v191_v19 = vadd.f32 %v186_v16, %v25_v15  ;;  %v143_v20 = vadd.f32 %v142_v18, %v119_v17 }
  0xad   :  { %194 = vst.msk [vmem:[#allocation2] sm:$0xff] %vm22_vm0, %v191_v19 }
  0xae   :  { %v165_v21 = vpop.f32.mrf.mxu2  ;;  %v188_v22 = vpop.f32.mrf.mxu3 }
  0xaf   :  { %v166_v23 = vadd.f32 %v165_v21, %v143_v20 }
  0xb1   :  { %v189_v25 = vadd.f32 %v188_v22, %v166_v23 }
  0xb3   :  { %v192_v26 = vadd.f32 %v189_v25, %v26_v24 }
  0xb4   :  { %v199_v27 = vld [vmem:[#allocation2] sm:$0xff] }
  0xb5   :  { %195 = vst.msk [vmem:[#allocation2 + $0x8] sm:$0xff] %vm22_vm0, %v192_v26 }
  0xb6   :  { %201 = vst.msk [vmem:[#allocation3] sm:$0xff] %vm22_vm0, %v199_v27 }
  0xbc   :  { %v200_v28 = vld [vmem:[#allocation2 + $0x8] sm:$0xff] }
  0xbd   :  { %202 = vst.msk [vmem:[#allocation3 + $0x8] sm:$0xff] %vm22_vm0, %v200_v28 }
  0xbe   :  { %215 = dma.vmem_to_hbm [thread:$0]  %s208_s1, 256, %s210_s29, [#allocation4], %s253_s30, %s253_s30, %s254_s5  }
  0xbf   :  { %249 = dma.done.wait [#allocation4], 256  }
  0xc0   :  { %250 = vsyncadd [#allocation4], 4294967040 }
  0xc1   :  { %220 = vsyncpa [#allocation4], 1 }

</bundles_post_ra>
